<compile_context>
chip_gen: v7x
topology: tpu7x:2x2x1
jax: 0.10.0
libtpu: 0.0.40
codegen_flags: <defaults>
</compile_context>

<pallas_src>
import functools

import jax
import jax.numpy as jnp
from jax.experimental import pallas as pl
from jax.experimental.pallas import tpu as pltpu

NUM_CLASSES = 7
# Deterministic synthetic class weights (CLASS_WEIGHTS['combined'] stand-in).
CLASS_WEIGHTS_COMBINED = tuple(1.0 + 0.1 * i for i in range(NUM_CLASSES))

ALPHA = 1.0
SMOOTH = 1e-5
_LANE = 128
_TILE_PIXELS = 32768   # lane-dense pixels per grid step (always 128 * 2**k)


def _fold_lanes_to_vreg(v):
    """Tree-reduce the lane axis of (rows, width) down to (rows, 128).

    width is 128 * 2**k by construction, so every slice boundary is a multiple
    of 128 (vreg-aligned adds, no relayout, log-depth dependency chain)."""
    width = v.shape[-1]
    while width > _LANE:
        half = width // 2
        v = v[:, :half] + v[:, half:]
        width = half
    return v


def _loss_kernel(x_ref, t_ref,
                 focal_out, inter_out, zsum_out, ysum_out,
                 *, class_weights, num_classes):
    j = pl.program_id(2)   # pixel-tile axis (innermost, "arbitrary")

    @pl.when(j == 0)
    def _():
        focal_out[...] = jnp.zeros_like(focal_out)
        inter_out[...] = jnp.zeros_like(inter_out)
        zsum_out[...] = jnp.zeros_like(zsum_out)
        ysum_out[...] = jnp.zeros_like(ysum_out)

    x = x_ref[0].astype(jnp.float32)     # (C, TP) logits, channels on sublanes
    t = t_ref[0]                         # (1, TP) int32 labels (padding = -1)

    # boolean one-hot mask over the channel (sublane) axis; padded pixels -> all False
    mask = jax.lax.broadcasted_iota(jnp.int32, x.shape, 0) == t          # (C, TP)

    # class-weight column rebuilt from Python scalars (no captured array constant)
    cidx = jax.lax.broadcasted_iota(jnp.int32, (num_classes, 1), 0)
    wcol = jnp.full((num_classes, 1), float(class_weights[0]), jnp.float32)
    for i in range(1, num_classes):
        wcol = jnp.where(cidx == i, float(class_weights[i]), wcol)

    # --- log-softmax over the class (sublane) axis -------------------------------
    m = jnp.max(x, axis=0, keepdims=True)                                # (1, TP)
    z = x - m
    lse = jnp.log(jnp.sum(jnp.exp(z), axis=0, keepdims=True))            # (1, TP)
    logp = z - lse                                                       # (C, TP)

    # --- focal: weight fused into logp; single masked sublane reduce -------------
    # s = -ce = w[target] * logp[target]   (0 for padded pixels)
    s = jnp.sum(jnp.where(mask, logp * wcol, 0.0), axis=0, keepdims=True)  # (1,TP)
    pt = jnp.exp(s)
    omp = 1.0 - pt
    focal = ((-ALPHA) * s) * omp * omp                                    # (1, TP)

    # --- per-step lane tree-reduce, accumulate into resident lane-dense outputs --
    focal_out[0] += _fold_lanes_to_vreg(focal)                       # (1, 128)
    inter_out[0] += _fold_lanes_to_vreg(jnp.where(mask, x, 0.0))     # (C, 128)
    zsum_out[0] += _fold_lanes_to_vreg(x * x)                        # (C, 128)
    ysum_out[0] += _fold_lanes_to_vreg(jnp.where(mask, 1.0, 0.0))    # (C, 128)


def multi_organ_cross_species_loss(inputs_nchw, targets_nhw,
                                   class_weights=CLASS_WEIGHTS_COMBINED,
                                   tile_pixels=_TILE_PIXELS):
    """inputs_nchw: (N, C, H, W) float logits; targets_nhw: (N, H, W) int labels."""
    n, c, h, w = inputs_nchw.shape
    hw = h * w
    p_true = n * hw

    # channels stay on sublanes, pixels go on lanes — pure reshape, no transpose.
    logits = inputs_nchw.reshape(n, c, hw)                  # keep input dtype (bf16 OK)
    labels = targets_nhw.reshape(n, 1, hw).astype(jnp.int32)

    # lane-dense pixel tile: smallest 128*2**k covering hw, capped at tile_pixels.
    tp = _LANE
    while tp < hw and tp < tile_pixels:
        tp *= 2
    hw_pad = ((hw + tp - 1) // tp) * tp
    if hw_pad != hw:
        pad = hw_pad - hw
        logits = jnp.pad(logits, ((0, 0), (0, 0), (0, pad)))                      # 0 -> no dice term
        labels = jnp.pad(labels, ((0, 0), (0, 0), (0, pad)), constant_values=-1)  # -1 -> no focal term

    # split the pixel-tile axis in two for v7x's second TensorCore when possible
    n_blocks = hw_pad // tp
    if n_blocks % 2 == 0 and n_blocks >= 2:
        halves, n_j = 2, n_blocks // 2
    else:
        halves, n_j = 1, n_blocks

    grid = (n, halves, n_j)
    kernel = functools.partial(
        _loss_kernel,
        class_weights=tuple(float(v) for v in class_weights),
        num_classes=c)

    itemsize = jnp.dtype(logits.dtype).itemsize
    cost = pl.CostEstimate(
        flops=int(p_true * (8 * c + 12)),
        transcendentals=int(p_true * (c + 2)),
        bytes_accessed=int(n * hw_pad * (c * itemsize + 4)
                           + n * halves * (3 * c + 1) * _LANE * 4),
    )

    focal_p, inter_p, zsum_p, ysum_p = pl.pallas_call(
        kernel,
        out_shape=(
            jax.ShapeDtypeStruct((n * halves, 1, _LANE), jnp.float32),  # focal partial
            jax.ShapeDtypeStruct((n * halves, c, _LANE), jnp.float32),  # intersect partial
            jax.ShapeDtypeStruct((n * halves, c, _LANE), jnp.float32),  # sum(logit^2) partial
            jax.ShapeDtypeStruct((n * halves, c, _LANE), jnp.float32),  # sum(onehot) partial
        ),
        grid_spec=pltpu.PrefetchScalarGridSpec(
            num_scalar_prefetch=0,
            grid=grid,
            in_specs=[
                pl.BlockSpec((1, c, tp), lambda b, hh, j: (b, 0, hh * n_j + j)),  # logits tile
                pl.BlockSpec((1, 1, tp), lambda b, hh, j: (b, 0, hh * n_j + j)),  # labels tile
            ],
            out_specs=(
                pl.BlockSpec((1, 1, _LANE), lambda b, hh, j: (b * halves + hh, 0, 0)),
                pl.BlockSpec((1, c, _LANE), lambda b, hh, j: (b * halves + hh, 0, 0)),
                pl.BlockSpec((1, c, _LANE), lambda b, hh, j: (b * halves + hh, 0, 0)),
                pl.BlockSpec((1, c, _LANE), lambda b, hh, j: (b * halves + hh, 0, 0)),
            ),
        ),
        compiler_params=pltpu.CompilerParams(
            dimension_semantics=("parallel", "parallel", "arbitrary"),
            vmem_limit_bytes=32 * 1024 * 1024),
        cost_estimate=cost,
    )(logits, labels)

    # tiny final combine in plain JAX (batch/half grid axes stay parallel-safe)
    focal_mean = jnp.sum(focal_p) / float(p_true)
    inter = jnp.sum(inter_p, axis=(0, 2))
    zsum = jnp.sum(zsum_p, axis=(0, 2))
    ysum = jnp.sum(ysum_p, axis=(0, 2))
    dice = jnp.mean(1.0 - (2.0 * inter + SMOOTH) / (zsum + ysum + SMOOTH))
    return 0.75 * focal_mean + 1.0 * dice


def _reference_loss(inputs_nchw, targets_nhw, class_weights):
    """Plain-JAX reference mirroring the PyTorch module (mode='combined')."""
    n, c, h, w = inputs_nchw.shape
    x = inputs_nchw.astype(jnp.float32)
    t = targets_nhw.astype(jnp.int32)
    wts = jnp.asarray(class_weights, jnp.float32)

    logp = jax.nn.log_softmax(x, axis=1)                        # (N, C, H, W)
    onehot = jax.nn.one_hot(t, c, axis=1, dtype=jnp.float32)    # (N, C, H, W)
    logp_t = jnp.sum(onehot * logp, axis=1)                     # (N, H, W)
    w_t = jnp.sum(onehot * wts[None, :, None, None], axis=1)
    ce = -logp_t * w_t
    pt = jnp.exp(-ce)
    focal = jnp.mean(ALPHA * (1.0 - pt) ** 2 * ce)

    inter = jnp.sum(x * onehot, axis=(0, 2, 3))
    zsum = jnp.sum(x * x, axis=(0, 2, 3))
    ysum = jnp.sum(onehot, axis=(0, 2, 3))
    dice = jnp.mean(1.0 - (2.0 * inter + SMOOTH) / (zsum + ysum + SMOOTH))
    return 0.75 * focal + 1.0 * dice


if __name__ == "__main__":
    key = jax.random.PRNGKey(0)
    k1, k2 = jax.random.split(key)

    N, C, H, W = 2, NUM_CLASSES, 16, 16   # inputs: (2, 7, 16, 16), targets: (2, 16, 16)
    inputs = jax.random.normal(k1, (N, C, H, W), dtype=jnp.float32)
    targets = jax.random.randint(k2, (N, H, W), 0, C, dtype=jnp.int32)

    loss = multi_organ_cross_species_loss(inputs, targets, CLASS_WEIGHTS_COMBINED)
    loss = jax.block_until_ready(loss)

    ref = jax.block_until_ready(_reference_loss(inputs, targets, CLASS_WEIGHTS_COMBINED))
    assert jnp.allclose(loss, ref, rtol=1e-4, atol=1e-4), (loss, ref)

    # TODO(synk): only mode='combined' is implemented; 'separate'/'analogous' modes and the
    # host-side similarity-weight lookup are trivial scalar logic outside the kernel.
    print("KERNEL_OK")
</pallas_src>

<mosaic_0001>
module attributes {stable_mosaic.version = 11 : i64} {
  func.func @_loss_kernel(%arg0: i32, %arg1: i32, %arg2: i32, %arg3: memref<1x7x256xf32, #tpu.memory_space<vmem>>, %arg4: memref<1x1x256xi32, #tpu.memory_space<vmem>>, %arg5: memref<1x1x128xf32, #tpu.memory_space<vmem>>, %arg6: memref<1x7x128xf32, #tpu.memory_space<vmem>>, %arg7: memref<1x7x128xf32, #tpu.memory_space<vmem>>, %arg8: memref<1x7x128xf32, #tpu.memory_space<vmem>>) attributes {dimension_semantics = [#tpu.dimension_semantics<parallel>, #tpu.dimension_semantics<parallel>, #tpu.dimension_semantics<arbitrary>], iteration_bounds = array<i64: 2, 1, 1>, scalar_prefetch = 0 : i64, scratch_operands = 0 : i64, tpu.core_type = #tpu.core_type<tc>, window_params = [{transform_indices = @transform_0, window_bounds = array<i64: 1, 7, 256>}, {transform_indices = @transform_1, window_bounds = array<i64: 1, 1, 256>}, {transform_indices = @transform_2, window_bounds = array<i64: 1, 1, 128>}, {transform_indices = @transform_3, window_bounds = array<i64: 1, 7, 128>}, {transform_indices = @transform_4, window_bounds = array<i64: 1, 7, 128>}, {transform_indices = @transform_5, window_bounds = array<i64: 1, 7, 128>}]} {
    %c0_i32 = arith.constant 0 : i32
    %0 = arith.cmpi eq, %arg2, %c0_i32 : i32
    %1 = arith.extui %0 : i1 to i32
    %c0_i32_0 = arith.constant 0 : i32
    %2 = arith.cmpi ne, %1, %c0_i32_0 : i32
    scf.if %2 {
      %cst_45 = arith.constant 0.000000e+00 : f32
      %101 = vector.broadcast %cst_45 : f32 to vector<1x1x128xf32>
      %c0_46 = arith.constant 0 : index
      %c0_47 = arith.constant 0 : index
      %c0_48 = arith.constant 0 : index
      %102 = vector.load %arg5[%c0_46, %c0_47, %c0_48] : memref<1x1x128xf32, #tpu.memory_space<vmem>>, vector<1x1x128xf32>
      tpu.vector_store %arg5[%c0_46, %c0_47, %c0_48], %101 {strides = array<i32>} : memref<1x1x128xf32, #tpu.memory_space<vmem>>, vector<1x1x128xf32>,
      %cst_49 = arith.constant 0.000000e+00 : f32
      %103 = vector.broadcast %cst_49 : f32 to vector<1x7x128xf32>
      %c0_50 = arith.constant 0 : index
      %c0_51 = arith.constant 0 : index
      %c0_52 = arith.constant 0 : index
      %104 = vector.load %arg6[%c0_50, %c0_51, %c0_52] : memref<1x7x128xf32, #tpu.memory_space<vmem>>, vector<1x7x128xf32>
      tpu.vector_store %arg6[%c0_50, %c0_51, %c0_52], %103 {strides = array<i32>} : memref<1x7x128xf32, #tpu.memory_space<vmem>>, vector<1x7x128xf32>,
      %cst_53 = arith.constant 0.000000e+00 : f32
      %105 = vector.broadcast %cst_53 : f32 to vector<1x7x128xf32>
      %c0_54 = arith.constant 0 : index
      %c0_55 = arith.constant 0 : index
      %c0_56 = arith.constant 0 : index
      %106 = vector.load %arg7[%c0_54, %c0_55, %c0_56] : memref<1x7x128xf32, #tpu.memory_space<vmem>>, vector<1x7x128xf32>
      tpu.vector_store %arg7[%c0_54, %c0_55, %c0_56], %105 {strides = array<i32>} : memref<1x7x128xf32, #tpu.memory_space<vmem>>, vector<1x7x128xf32>,
      %cst_57 = arith.constant 0.000000e+00 : f32
      %107 = vector.broadcast %cst_57 : f32 to vector<1x7x128xf32>
      %c0_58 = arith.constant 0 : index
      %c0_59 = arith.constant 0 : index
      %c0_60 = arith.constant 0 : index
      %108 = vector.load %arg8[%c0_58, %c0_59, %c0_60] : memref<1x7x128xf32, #tpu.memory_space<vmem>>, vector<1x7x128xf32>
      tpu.vector_store %arg8[%c0_58, %c0_59, %c0_60], %107 {strides = array<i32>} : memref<1x7x128xf32, #tpu.memory_space<vmem>>, vector<1x7x128xf32>,
    } else {
    }
    %c0 = arith.constant 0 : index
    %c0_1 = arith.constant 0 : index
    %c0_2 = arith.constant 0 : index
    %3 = vector.load %arg3[%c0, %c0_1, %c0_2] : memref<1x7x256xf32, #tpu.memory_space<vmem>>, vector<1x7x256xf32>
    %4 = vector.shape_cast %3 : vector<1x7x256xf32> to vector<7x256xf32>
    %c0_3 = arith.constant 0 : index
    %c0_4 = arith.constant 0 : index
    %c0_5 = arith.constant 0 : index
    %5 = vector.load %arg4[%c0_3, %c0_4, %c0_5] : memref<1x1x256xi32, #tpu.memory_space<vmem>>, vector<1x1x256xi32>
    %6 = vector.shape_cast %5 : vector<1x1x256xi32> to vector<1x256xi32>
    %7 = tpu.iota {dimensions = array<i32: 0>} : vector<7x256xi32>
    %8 = vector.broadcast %6 : vector<1x256xi32> to vector<7x256xi32>
    %9 = arith.cmpi eq, %7, %8 : vector<7x256xi32>
    %10 = tpu.iota {dimensions = array<i32: 0>} : vector<7x1xi32>
    %cst = arith.constant 1.000000e+00 : f32
    %11 = vector.broadcast %cst : f32 to vector<7x1xf32>
    %c1_i32 = arith.constant 1 : i32
    %12 = vector.broadcast %c1_i32 : i32 to vector<7x1xi32>
    %13 = arith.cmpi eq, %10, %12 : vector<7x1xi32>
    %cst_6 = arith.constant 1.100000e+00 : f32
    %14 = vector.broadcast %cst_6 : f32 to vector<7x1xf32>
    %15 = arith.select %13, %14, %11 : vector<7x1xi1>, vector<7x1xf32>
    %c2_i32 = arith.constant 2 : i32
    %16 = vector.broadcast %c2_i32 : i32 to vector<7x1xi32>
    %17 = arith.cmpi eq, %10, %16 : vector<7x1xi32>
    %cst_7 = arith.constant 1.200000e+00 : f32
    %18 = vector.broadcast %cst_7 : f32 to vector<7x1xf32>
    %19 = arith.select %17, %18, %15 : vector<7x1xi1>, vector<7x1xf32>
    %c3_i32 = arith.constant 3 : i32
    %20 = vector.broadcast %c3_i32 : i32 to vector<7x1xi32>
    %21 = arith.cmpi eq, %10, %20 : vector<7x1xi32>
    %cst_8 = arith.constant 1.300000e+00 : f32
    %22 = vector.broadcast %cst_8 : f32 to vector<7x1xf32>
    %23 = arith.select %21, %22, %19 : vector<7x1xi1>, vector<7x1xf32>
    %c4_i32 = arith.constant 4 : i32
    %24 = vector.broadcast %c4_i32 : i32 to vector<7x1xi32>
    %25 = arith.cmpi eq, %10, %24 : vector<7x1xi32>
    %cst_9 = arith.constant 1.400000e+00 : f32
    %26 = vector.broadcast %cst_9 : f32 to vector<7x1xf32>
    %27 = arith.select %25, %26, %23 : vector<7x1xi1>, vector<7x1xf32>
    %c5_i32 = arith.constant 5 : i32
    %28 = vector.broadcast %c5_i32 : i32 to vector<7x1xi32>
    %29 = arith.cmpi eq, %10, %28 : vector<7x1xi32>
    %cst_10 = arith.constant 1.500000e+00 : f32
    %30 = vector.broadcast %cst_10 : f32 to vector<7x1xf32>
    %31 = arith.select %29, %30, %27 : vector<7x1xi1>, vector<7x1xf32>
    %c6_i32 = arith.constant 6 : i32
    %32 = vector.broadcast %c6_i32 : i32 to vector<7x1xi32>
    %33 = arith.cmpi eq, %10, %32 : vector<7x1xi32>
    %cst_11 = arith.constant 1.600000e+00 : f32
    %34 = vector.broadcast %cst_11 : f32 to vector<7x1xf32>
    %35 = arith.select %33, %34, %31 : vector<7x1xi1>, vector<7x1xf32>
    %cst_12 = arith.constant dense<0xFF800000> : vector<256xf32>
    %36 = vector.multi_reduction <maximumf>, %4, %cst_12 [0] : vector<7x256xf32> to vector<256xf32>
    %37 = vector.shape_cast %36 : vector<256xf32> to vector<1x256xf32>
    %38 = vector.broadcast %37 : vector<1x256xf32> to vector<7x256xf32>
    %39 = arith.subf %4, %38 : vector<7x256xf32>
    %40 = math.exp %39 : vector<7x256xf32>
    %cst_13 = arith.constant dense<0.000000e+00> : vector<256xf32>
    %41 = vector.multi_reduction <add>, %40, %cst_13 [0] : vector<7x256xf32> to vector<256xf32>
    %42 = vector.shape_cast %41 : vector<256xf32> to vector<1x256xf32>
    %43 = math.log %42 : vector<1x256xf32>
    %44 = vector.broadcast %43 : vector<1x256xf32> to vector<7x256xf32>
    %45 = arith.subf %39, %44 : vector<7x256xf32>
    %46 = vector.broadcast %35 : vector<7x1xf32> to vector<7x256xf32>
    %47 = arith.mulf %45, %46 : vector<7x256xf32>
    %cst_14 = arith.constant 0.000000e+00 : f32
    %48 = vector.broadcast %cst_14 : f32 to vector<7x256xf32>
    %49 = arith.select %9, %47, %48 : vector<7x256xi1>, vector<7x256xf32>
    %cst_15 = arith.constant dense<0.000000e+00> : vector<256xf32>
    %50 = vector.multi_reduction <add>, %49, %cst_15 [0] : vector<7x256xf32> to vector<256xf32>
    %51 = vector.shape_cast %50 : vector<256xf32> to vector<1x256xf32>
    %52 = math.exp %51 : vector<1x256xf32>
    %cst_16 = arith.constant 1.000000e+00 : f32
    %53 = vector.broadcast %cst_16 : f32 to vector<1x256xf32>
    %54 = arith.subf %53, %52 : vector<1x256xf32>
    %cst_17 = arith.constant -1.000000e+00 : f32
    %55 = vector.broadcast %cst_17 : f32 to vector<1x256xf32>
    %56 = arith.mulf %55, %51 : vector<1x256xf32>
    %57 = arith.mulf %56, %54 : vector<1x256xf32>
    %58 = arith.mulf %57, %54 : vector<1x256xf32>
    %c0_18 = arith.constant 0 : index
    %c0_19 = arith.constant 0 : index
    %c0_20 = arith.constant 0 : index
    %59 = vector.load %arg5[%c0_18, %c0_19, %c0_20] : memref<1x1x128xf32, #tpu.memory_space<vmem>>, vector<1x1x128xf32>
    %60 = vector.shape_cast %59 : vector<1x1x128xf32> to vector<1x128xf32>
    %61 = vector.extract_strided_slice %58 {offsets = [0, 0], sizes = [1, 128], strides = [1, 1]} : vector<1x256xf32> to vector<1x128xf32>
    %62 = vector.extract_strided_slice %58 {offsets = [0, 128], sizes = [1, 128], strides = [1, 1]} : vector<1x256xf32> to vector<1x128xf32>
    %63 = arith.addf %61, %62 : vector<1x128xf32>
    %64 = arith.addf %60, %63 : vector<1x128xf32>
    %c0_21 = arith.constant 0 : index
    %c0_22 = arith.constant 0 : index
    %c0_23 = arith.constant 0 : index
    %65 = vector.load %arg5[%c0_21, %c0_22, %c0_23] : memref<1x1x128xf32, #tpu.memory_space<vmem>>, vector<1x1x128xf32>
    %66 = vector.shape_cast %65 : vector<1x1x128xf32> to vector<1x128xf32>
    %67 = vector.shape_cast %64 : vector<1x128xf32> to vector<1x1x128xf32>
    tpu.vector_store %arg5[%c0_21, %c0_22, %c0_23], %67 {strides = array<i32>} : memref<1x1x128xf32, #tpu.memory_space<vmem>>, vector<1x1x128xf32>,
    %c0_24 = arith.constant 0 : index
    %c0_25 = arith.constant 0 : index
    %c0_26 = arith.constant 0 : index
    %68 = vector.load %arg6[%c0_24, %c0_25, %c0_26] : memref<1x7x128xf32, #tpu.memory_space<vmem>>, vector<1x7x128xf32>
    %69 = vector.shape_cast %68 : vector<1x7x128xf32> to vector<7x128xf32>
    %cst_27 = arith.constant 0.000000e+00 : f32
    %70 = vector.broadcast %cst_27 : f32 to vector<7x256xf32>
    %71 = arith.select %9, %4, %70 : vector<7x256xi1>, vector<7x256xf32>
    %72 = vector.extract_strided_slice %71 {offsets = [0, 0], sizes = [7, 128], strides = [1, 1]} : vector<7x256xf32> to vector<7x128xf32>
    %73 = vector.extract_strided_slice %71 {offsets = [0, 128], sizes = [7, 128], strides = [1, 1]} : vector<7x256xf32> to vector<7x128xf32>
    %74 = arith.addf %72, %73 : vector<7x128xf32>
    %75 = arith.addf %69, %74 : vector<7x128xf32>
    %c0_28 = arith.constant 0 : index
    %c0_29 = arith.constant 0 : index
    %c0_30 = arith.constant 0 : index
    %76 = vector.load %arg6[%c0_28, %c0_29, %c0_30] : memref<1x7x128xf32, #tpu.memory_space<vmem>>, vector<1x7x128xf32>
    %77 = vector.shape_cast %76 : vector<1x7x128xf32> to vector<7x128xf32>
    %78 = vector.shape_cast %75 : vector<7x128xf32> to vector<1x7x128xf32>
    tpu.vector_store %arg6[%c0_28, %c0_29, %c0_30], %78 {strides = array<i32>} : memref<1x7x128xf32, #tpu.memory_space<vmem>>, vector<1x7x128xf32>,
    %c0_31 = arith.constant 0 : index
    %c0_32 = arith.constant 0 : index
    %c0_33 = arith.constant 0 : index
    %79 = vector.load %arg7[%c0_31, %c0_32, %c0_33] : memref<1x7x128xf32, #tpu.memory_space<vmem>>, vector<1x7x128xf32>
    %80 = vector.shape_cast %79 : vector<1x7x128xf32> to vector<7x128xf32>
    %81 = arith.mulf %4, %4 : vector<7x256xf32>
    %82 = vector.extract_strided_slice %81 {offsets = [0, 0], sizes = [7, 128], strides = [1, 1]} : vector<7x256xf32> to vector<7x128xf32>
    %83 = vector.extract_strided_slice %81 {offsets = [0, 128], sizes = [7, 128], strides = [1, 1]} : vector<7x256xf32> to vector<7x128xf32>
    %84 = arith.addf %82, %83 : vector<7x128xf32>
    %85 = arith.addf %80, %84 : vector<7x128xf32>
    %c0_34 = arith.constant 0 : index
    %c0_35 = arith.constant 0 : index
    %c0_36 = arith.constant 0 : index
    %86 = vector.load %arg7[%c0_34, %c0_35, %c0_36] : memref<1x7x128xf32, #tpu.memory_space<vmem>>, vector<1x7x128xf32>
    %87 = vector.shape_cast %86 : vector<1x7x128xf32> to vector<7x128xf32>
    %88 = vector.shape_cast %85 : vector<7x128xf32> to vector<1x7x128xf32>
    tpu.vector_store %arg7[%c0_34, %c0_35, %c0_36], %88 {strides = array<i32>} : memref<1x7x128xf32, #tpu.memory_space<vmem>>, vector<1x7x128xf32>,
    %c0_37 = arith.constant 0 : index
    %c0_38 = arith.constant 0 : index
    %c0_39 = arith.constant 0 : index
    %89 = vector.load %arg8[%c0_37, %c0_38, %c0_39] : memref<1x7x128xf32, #tpu.memory_space<vmem>>, vector<1x7x128xf32>
    %90 = vector.shape_cast %89 : vector<1x7x128xf32> to vector<7x128xf32>
    %cst_40 = arith.constant 1.000000e+00 : f32
    %cst_41 = arith.constant 0.000000e+00 : f32
    %91 = vector.broadcast %cst_40 : f32 to vector<7x256xf32>
    %92 = vector.broadcast %cst_41 : f32 to vector<7x256xf32>
    %93 = arith.select %9, %91, %92 : vector<7x256xi1>, vector<7x256xf32>
    %94 = vector.extract_strided_slice %93 {offsets = [0, 0], sizes = [7, 128], strides = [1, 1]} : vector<7x256xf32> to vector<7x128xf32>
    %95 = vector.extract_strided_slice %93 {offsets = [0, 128], sizes = [7, 128], strides = [1, 1]} : vector<7x256xf32> to vector<7x128xf32>
    %96 = arith.addf %94, %95 : vector<7x128xf32>
    %97 = arith.addf %90, %96 : vector<7x128xf32>
    %c0_42 = arith.constant 0 : index
    %c0_43 = arith.constant 0 : index
    %c0_44 = arith.constant 0 : index
    %98 = vector.load %arg8[%c0_42, %c0_43, %c0_44] : memref<1x7x128xf32, #tpu.memory_space<vmem>>, vector<1x7x128xf32>
    %99 = vector.shape_cast %98 : vector<1x7x128xf32> to vector<7x128xf32>
    %100 = vector.shape_cast %97 : vector<7x128xf32> to vector<1x7x128xf32>
    tpu.vector_store %arg8[%c0_42, %c0_43, %c0_44], %100 {strides = array<i32>} : memref<1x7x128xf32, #tpu.memory_space<vmem>>, vector<1x7x128xf32>,
    return
  }
  func.func @transform_0(%arg0: i32, %arg1: i32, %arg2: i32) -> (i32, i32, i32) {
    %c1_i32 = arith.constant 1 : i32
    %0 = arith.muli %arg1, %c1_i32 : i32
    %1 = arith.addi %0, %arg2 : i32
    %c0_i32 = arith.constant 0 : i32
    %c0_i32_0 = arith.constant 0 : i32
    return %arg0, %c0_i32, %1 : i32, i32, i32
  }
  func.func @transform_1(%arg0: i32, %arg1: i32, %arg2: i32) -> (i32, i32, i32) {
    %c1_i32 = arith.constant 1 : i32
    %0 = arith.muli %arg1, %c1_i32 : i32
    %1 = arith.addi %0, %arg2 : i32
    %c0_i32 = arith.constant 0 : i32
    %c0_i32_0 = arith.constant 0 : i32
    return %arg0, %c0_i32, %1 : i32, i32, i32
  }
  func.func @transform_2(%arg0: i32, %arg1: i32, %arg2: i32) -> (i32, i32, i32) {
    %c1_i32 = arith.constant 1 : i32
    %0 = arith.muli %arg0, %c1_i32 : i32
    %1 = arith.addi %0, %arg1 : i32
    %c0_i32 = arith.constant 0 : i32
    %c0_i32_0 = arith.constant 0 : i32
    %c0_i32_1 = arith.constant 0 : i32
    return %1, %c0_i32, %c0_i32_0 : i32, i32, i32
  }
  func.func @transform_3(%arg0: i32, %arg1: i32, %arg2: i32) -> (i32, i32, i32) {
    %c1_i32 = arith.constant 1 : i32
    %0 = arith.muli %arg0, %c1_i32 : i32
    %1 = arith.addi %0, %arg1 : i32
    %c0_i32 = arith.constant 0 : i32
    %c0_i32_0 = arith.constant 0 : i32
    %c0_i32_1 = arith.constant 0 : i32
    return %1, %c0_i32, %c0_i32_0 : i32, i32, i32
  }
  func.func @transform_4(%arg0: i32, %arg1: i32, %arg2: i32) -> (i32, i32, i32) {
    %c1_i32 = arith.constant 1 : i32
    %0 = arith.muli %arg0, %c1_i32 : i32
    %1 = arith.addi %0, %arg1 : i32
    %c0_i32 = arith.constant 0 : i32
    %c0_i32_0 = arith.constant 0 : i32
    %c0_i32_1 = arith.constant 0 : i32
    return %1, %c0_i32, %c0_i32_0 : i32, i32, i32
  }
  func.func @transform_5(%arg0: i32, %arg1: i32, %arg2: i32) -> (i32, i32, i32) {
    %c1_i32 = arith.constant 1 : i32
    %0 = arith.muli %arg0, %c1_i32 : i32
    %1 = arith.addi %0, %arg1 : i32
    %c0_i32 = arith.constant 0 : i32
    %c0_i32_0 = arith.constant 0 : i32
    %c0_i32_1 = arith.constant 0 : i32
    return %1, %c0_i32, %c0_i32_0 : i32, i32, i32
  }
}

</mosaic_0001>

<bundles_post_ra>
// kernel: tpu_custom_call.1
= control target key start
LH: loop header
LB: loop body
LE: loop exit
PB: predicated region body
PF: predicated region fallthrough
CT: control target
= control target key end

     0   :  { %11 = vsyncpa [#allocation3], 0  ;;  %s1073_s0 = inlined_call_operand.vmem [shape: f32[2,7,256], index: 0, kind: input, shape index: {}]   ;;  %s1074_s1 = inlined_call_operand.vmem [shape: s32[2,1,256], index: 1, kind: input, shape index: {}]   ;;  %s1075_s2 = inlined_call_operand.hbm [shape: f32[2,1,128], index: 2, kind: output, shape index: {0}]   ;;  %s1076_s3 = inlined_call_operand.vmem [shape: f32[2,7,128], index: 3, kind: output, shape index: {1}]   ;;  %s1077_s4 = inlined_call_operand.vmem [shape: f32[2,7,128], index: 4, kind: output, shape index: {2}]   ;;  %s1078_s5 = inlined_call_operand.vmem [shape: f32[2,7,128], index: 5, kind: output, shape index: {3}]  }
   0x1   :  { %13 = vsyncpa [#allocation3 + $0x1], 0  ;;  %s882_s18 = smov 0   ;;  %s884_s19 = smov 0  }
   0x2   :  { %s886_s20 = smov 0   ;;  %s888_s21 = smov 0  }
   0x3   :  { %s890_s22 = smov 0   ;;  %s892_s23 = smov 0  }
   0x4 LB: > { %s685_s24 = sadd.s32 4294967295, %s847_s23   ;;  %s686_s25 = sadd.s32 4294967294, %s847_s23   ;;  %s847_s23 = sphi %s892_s23, %s19_s23   ;;  %s843_s22 = sphi %s890_s22, %s1085_s22   ;;  %s839_s21 = sphi %s888_s21, %s1084_s21   ;;  %s835_s20 = sphi %s886_s20, %s1083_s20   ;;  %s831_s19 = sphi %s884_s19, %s1082_s19   ;;  %s827_s18 = sphi %s882_s18, %s1081_s18  }
   0x5   : > { %s38_s26 = sadd.s32 1, %s843_s22  ;;  %s107_s27 = sadd.s32 1, %s835_s20 }
   0x6   : > { %p40_p0 = scmp.ge.s32.totalorder %s38_s26, 2  ;;  %p117_p1 = scmp.ne.s32.totalorder %s835_s20, %s831_s19 }
   0x7   : > { %p118_p2 = scmp.eq.s32.totalorder %s685_s24, 1  ;;  %p123_p3 = scmp.ne.s32.totalorder %s831_s19, %s827_s18 }
   0x8   : > { %s1087_s26 = smov (%p40_p0, %s38_s26), 0  ;;  %p124_p5 = scmp.eq.s32.totalorder %s686_s25, 1 }
   0x9   : > { %p922_p4 = por %p118_p2, %p117_p1  ;;  %s104_s29 = ssub.s32 %s843_s22, %s1087_s26 }
   0xa   : > { %p689_p6 = scmp.ge.s32.totalorder %s847_s23, 1  ;;  %p105_p7 = scmp.eq.s32.totalorder %s104_s29, 0 }
   0xb   : > { %p929_p8 = por %p124_p5, %p123_p3  ;;  %p255_p9 = scmp.lt.s32.totalorder %s847_s23, 3 }
   0xc   : > { %s935_s6 = scalar_select %p105_p7, %s835_s20, %s107_s27  }
   0xd   : > { %p256_p10 = pnand %p689_p6, %p255_p9 }
   0xe   : > { %s288_s7 = sand.u32 (!%p256_p10), 1, %s831_s19   ;;  %p313_p11 = scmp.lt.s32.totalorder (!%p256_p10), %s839_s21, 1  ;;  %v364_v0 = vlaneseq (!%p256_p10)  ;;  %v849_v1 = vmov (!%p256_p10), 0.0   ;;  %vm388_vm0 = vcmask (!%p256_p10), 1046528   ;;  %v850_v56 = vmov (!%p256_p10), 1.0  }
   0xf   : > { %259 = sbr.rel (%p256_p10) target bundleno = 137 (0x89), region = 28  ;;  %s941_s8 = scalar_lea.vmem (!%p256_p10), [#allocation2], %s288_s7 }
  0x10   : > { %357 = vst [vmem:[%s941_s8] sm:$0x1] (!%p256_p10), %v849_v1  ;;  %v945_v2 = vshrl.u32 (!%p256_p10), %v364_v0, 7  ;;  %s696_s15 = sshll.u32 (!%p256_p10), %s839_s21, 4  ;;  %s510_s16 = sshll.u32 (!%p256_p10), %s941_s8, 4  ;;  %s1025_s16 = int_to_ptr.vmem [resolvable:$true] %s510_s16 }
  0x11   : > { %s1023_s25 = scalar_lea.hbm (!%p256_p10), %s1075_s2, %s696_s15  ;;  %s482_s27 = scalar_lea.sflag (!%p256_p10), [#allocation3], %s288_s7 }
  0x12   : > { %v368_v3 = vsub.s32 (!%p256_p10), 0, %v945_v2  ;;  %v372_v4 = vsub.s32 (!%p256_p10), 1, %v945_v2  ;;  %vm376_vm3 = vcmp.eq.s32.totalorder (!%p256_p10), %v945_v2, 1  ;;  %vm378_vm4 = vcmp.eq.s32.totalorder (!%p256_p10), %v945_v2, 2 }
  0x13   : > { %v377_v57 = vsel (!%p256_p10), %vm376_vm3, 1.1, %v850_v56  ;;  %vm380_vm5 = vcmp.eq.s32.totalorder (!%p256_p10), %v945_v2, 3  ;;  %vm382_vm6 = vcmp.eq.s32.totalorder (!%p256_p10), %v945_v2, 4  ;;  %vm384_vm7 = vcmp.eq.s32.totalorder (!%p256_p10), %v945_v2, 5 }
  0x14   : > { %v379_v61 = vsel (!%p256_p10), %vm378_vm4, 1.2, %v377_v57  ;;  %vm386_vm8 = vcmp.eq.s32.totalorder (!%p256_p10), %v945_v2, 6 }
  0x15   : > { %v381_v62 = vsel (!%p256_p10), %vm380_vm5, 1.3, %v379_v61 }
  0x16   : > { %s314_s9 = scalar_select %p313_p11, %s839_s21, 1  ;;  %v383_v63 = vsel %vm382_vm6, 1.4, %v381_v62 }
  0x17   : > { %v385_v0 = vsel %vm384_vm7, 1.5, %v383_v63  ;;  %s851_s21 = smov [#allocation2]  }
  0x18   : > { %s699_s10 = sshll.u32 %s314_s9, 4  ;;  %s692_s11 = sshll.u32 %s314_s9, 1 }
  0x19   : > { %s320_s14 = scalar_lea.vmem %s1073_s0, %s699_s10  ;;  %s331_s17 = scalar_lea.vmem %s1074_s1, %s692_s11 }
  0x1a   : > { %s693_s24 = sshll.u32 %s314_s9, 3  ;;  %v361_v5 = vld [vmem:[%s320_s14] sm:$0x7f]  ;;  %v362_v6 = vld [vmem:[%s320_s14 + $0x8] sm:$0x7f]  ;;  %s773_s12 = sshll.u32 %s851_s21, 4  ;;  %s774_s12 = int_to_ptr.vmem [resolvable:$false] %s773_s12 }
  0x1b   : > { %s958_s29 = scalar_lea.vmem %s1076_s3, %s693_s24  ;;  %v363_v7 = vld [vmem:[%s331_s17] sm:$0x3]  ;;  %v389_v8 = vsel %vm388_vm0, %v361_v5, -inf  ;;  %v396_v9 = vsel %vm388_vm0, %v362_v6, -inf  ;;  %s965_s13 = scalar_lea.vmem %s1077_s4, %s693_s24  ;;  %v470_v13 = vmul.f32 %v361_v5, %v361_v5  ;;  %v471_v15 = vmul.f32 %v362_v6, %v362_v6 }
  0x1c   : > { %358 = vst [vmem:[%s958_s29] sm:$0x7f] %v849_v1  ;;  %v968_v10 = vrot.slane %v363_v7, %v368_v3  ;;  %v970_v11 = vrot.slane %v363_v7, %v372_v4  ;;  %v390_v12 = vrot.slane %v389_v8, 4  ;;  %359 = vst [vmem:[%s965_s13] sm:$0x7f] %v849_v1  ;;  %s976_s14 = scalar_lea.vmem %s1078_s5, %s693_s24  ;;  %v397_v14 = vrot.slane %v396_v9, 4  ;;  %s775_s10 = scalar_lea.vmem %s774_s12, 32 }
  0x1d   : > { %360 = vst [vmem:[%s976_s14] sm:$0x7f] %v849_v1  ;;  %v472_v22 = vadd.f32 %v471_v15, %v470_v13  ;;  %p776_p1 = scmp.lt.s32.totalorder %s1025_s16, %s774_s12 }
  0x1e   : > { %vm374_vm1 = vcmp.eq.s32.totalorder %v945_v2, %v968_v10  ;;  %vm375_vm2 = vcmp.eq.s32.totalorder %v945_v2, %v970_v11  ;;  %v391_v16 = vmax.f32 %v389_v8, %v390_v12  ;;  %v398_v17 = vmax.f32 %v396_v9, %v397_v14 }
  0x1f   : > { %v464_v18 = vsel %vm374_vm1, %v361_v5, 0.0  ;;  %v465_v19 = vsel %vm375_vm2, %v362_v6, 0.0  ;;  %v476_v23 = vsel %vm374_vm1, 1.0, %v849_v1  ;;  %v477_v25 = vsel %vm375_vm2, 1.0, %v849_v1 }
  0x20   : > { %v392_v20 = vrot.slane %v391_v16, 2  ;;  %v466_v21 = vadd.f32 %v465_v19, %v464_v18  ;;  %v399_v24 = vrot.slane %v398_v17, 2  ;;  %v478_v27 = vadd.f32 %v477_v25, %v476_v23 }
  0x22   : > { %v393_v26 = vmax.f32 %v391_v16, %v392_v20  ;;  %v400_v28 = vmax.f32 %v398_v17, %v399_v24 }
  0x23   : > { %v463_v29 = vld [vmem:[%s958_s29] sm:$0x7f] }
  0x24   : > { %v469_v30 = vld [vmem:[%s965_s13] sm:$0x7f]  ;;  %v394_v31 = vrot.slane %v393_v26, 1  ;;  %v467_v32 = vadd.f32 %v466_v21, %v463_v29  ;;  %v401_v35 = vrot.slane %v400_v28, 1 }
  0x25   : > { %v473_v33 = vadd.f32 %v472_v22, %v469_v30  ;;  %v475_v34 = vld [vmem:[%s976_s14] sm:$0x7f] }
  0x26   : > { %v479_v36 = vadd.f32 %v478_v27, %v475_v34  ;;  %v395_v37 = vmax.f32 %v393_v26, %v394_v31  ;;  %468 = vst [vmem:[%s958_s29] sm:$0x7f] %v467_v32  ;;  %v402_v38 = vmax.f32 %v400_v28, %v401_v35  ;;  %s769_s29 = scalar_lea.vmem %s1025_s16, 16 }
  0x27   : > { %474 = vst [vmem:[%s965_s13] sm:$0x7f] %v473_v33  ;;  %p770_p12 = scmp.ne.s32.totalorder %s1025_s16, %s769_s29  ;;  %p777_p2 = scmp.lt.s32.totalorder %s775_s10, %s769_s29 }
  0x28   : > { %480 = vst [vmem:[%s976_s14] sm:$0x7f] %v479_v36  ;;  %v403_v39 = vsub.f32 %v361_v5, %v395_v37  ;;  %v404_v40 = vsub.f32 %v362_v6, %v402_v38  ;;  %v387_v5 = vsel %vm386_vm8, 1.6, %v385_v0  ;;  %v459_v38 = vld [vmem:[%s941_s8] sm:$0x1] }
  0x29   : > { %p771_p13 = pnand %p770_p12, %p922_p4  ;;  %p778_p3 = por %p777_p2, %p776_p1 }
  0x2a   : > { %v405_v41 = vmul.f32 1.442695, %v403_v39  ;;  %v407_v42 = vmul.f32 1.442695, %v404_v40 }
  0x2b   : > { %p772_p0 = pneg %p771_p13 }
  0x2c   : > { %757 = vpow2.f32 %v405_v41 }
  0x2d   : > { %759 = vpow2.f32 %v407_v42  ;;  %p779_p5 = pnand %p778_p3, %p772_p0 }
  0x36   : > { %v758_v43 = vpop.eup %757 }
  0x37   : > { %v760_v44 = vpop.eup %759  ;;  %v409_v45 = vsel %vm388_vm0, %v758_v43, 0.0 }
  0x38   : > { %v410_v46 = vrot.slane %v409_v45, 4  ;;  %v416_v47 = vsel %vm388_vm0, %v760_v44, 0.0 }
  0x39   : > { %v417_v48 = vrot.slane %v416_v47, 4 }
  0x3a   : > { %v411_v49 = vadd.f32 %v410_v46, %v409_v45 }
  0x3b   : > { %v418_v50 = vadd.f32 %v417_v48, %v416_v47 }
  0x3c   : > { %v412_v51 = vrot.slane %v411_v49, 2 }
  0x3d   : > { %v419_v52 = vrot.slane %v418_v50, 2 }
  0x3e   : > { %v413_v53 = vadd.f32 %v412_v51, %v411_v49 }
  0x3f   : > { %v420_v54 = vadd.f32 %v419_v52, %v418_v50 }
  0x40   : > { %v414_v55 = vrot.slane %v413_v53, 1 }
  0x41   : > { %v421_v58 = vrot.slane %v420_v54, 1 }
  0x42   : > { %v415_v59 = vadd.f32 %v414_v55, %v413_v53 }
  0x43   : > { %v422_v60 = vadd.f32 %v421_v58, %v420_v54 }
  0x44   : > { %761 = vlog2.f32 %v415_v59 }
  0x45   : > { %763 = vlog2.f32 %v422_v60 }
  0x4e   : > { %v762_v1 = vpop.eup %761 }
  0x4f   : > { %v764_v3 = vpop.eup %763  ;;  %v424_v4 = vmul.f32 0.6931472, %v762_v1 }
  0x50   : > { %v426_v6 = vmul.f32 0.6931472, %v764_v3 }
  0x51   : > { %v427_v7 = vsub.f32 %v403_v39, %v424_v4 }
  0x52   : > { %v428_v8 = vsub.f32 %v404_v40, %v426_v6 }
  0x53   : > { %v429_v9 = vmul.f32 %v427_v7, %v387_v5 }
  0x54   : > { %v430_v12 = vmul.f32 %v428_v8, %v387_v5 }
  0x55   : > { %v431_v13 = vsel %vm374_vm1, %v429_v9, 0.0 }
  0x56   : > { %v432_v14 = vsel %vm375_vm2, %v430_v12, 0.0  ;;  %v433_v15 = vsel %vm388_vm0, %v431_v13, 0.0 }
  0x57   : > { %v434_v16 = vrot.slane %v433_v15, 4  ;;  %v440_v17 = vsel %vm388_vm0, %v432_v14, 0.0 }
  0x58   : > { %v441_v18 = vrot.slane %v440_v17, 4 }
  0x59   : > { %v435_v19 = vadd.f32 %v434_v16, %v433_v15 }
  0x5a   : > { %v442_v20 = vadd.f32 %v441_v18, %v440_v17 }
  0x5b   : > { %v436_v21 = vrot.slane %v435_v19, 2 }
  0x5c   : > { %v443_v22 = vrot.slane %v442_v20, 2 }
  0x5d   : > { %v437_v23 = vadd.f32 %v436_v21, %v435_v19 }
  0x5e   : > { %v444_v24 = vadd.f32 %v443_v22, %v442_v20 }
  0x5f   : > { %v438_v25 = vrot.slane %v437_v23, 1 }
  0x60   : > { %v445_v26 = vrot.slane %v444_v24, 1 }
  0x61   : > { %v439_v10 = vadd.f32 %v438_v25, %v437_v23 }
  0x62   : > { %v446_v27 = vadd.f32 %v445_v26, %v444_v24 }
  0x63   : > { %v447_v2 = vmul.f32 1.442695, %v439_v10  ;;  %v453_v28 = vmul.f32 -1.0, %v439_v10 }
  0x64   : > { %v449_v11 = vmul.f32 1.442695, %v446_v27  ;;  %v454_v30 = vmul.f32 -1.0, %v446_v27 }
  0x65   : > { %765 = vpow2.f32 %v447_v2 }
  0x66   : > { %767 = vpow2.f32 %v449_v11 }
  0x6f   : > { %v766_v29 = vpop.eup %765 }
  0x70   : > { %v768_v31 = vpop.eup %767  ;;  %v451_v32 = vsub.f32 1.0, %v766_v29 }
  0x71   : > { %v452_v33 = vsub.f32 1.0, %v768_v31 }
  0x72   : > { %v455_v34 = vmul.f32 %v453_v28, %v451_v32 }
  0x73   : > { %v456_v35 = vmul.f32 %v454_v30, %v452_v33 }
  0x74   : > { %v457_v36 = vmul.f32 %v455_v34, %v451_v32 }
  0x75   : > { %v458_v37 = vmul.f32 %v456_v35, %v452_v33 }
  0x77   : > { %v460_v39 = vadd.f32 %v458_v37, %v457_v36 }
  0x79   : > { %v461_v40 = vadd.f32 %v460_v39, %v459_v38 }
  0x7b   : > { %462 = vst [vmem:[%s941_s8] sm:$0x1] %v461_v40 }
  0x7c   : > { %782 = shalt.err (!%p779_p5)
}
  0x7d   : > { %s783_s7 = scalar_lea.hbm %s1023_s25, 16  ;;  %s787_s9 = scalar_lea.hbm %s1075_s2, 32 }
  0x7e   : > { %p784_p6 = scmp.ne.s32.totalorder %s1023_s25, %s783_s7  ;;  %p788_p10 = scmp.lt.u32.totalorder %s1023_s25, %s1075_s2 }
  0x7f   : > { %p789_p11 = scmp.lt.u32.totalorder %s787_s9, %s783_s7  ;;  %p791_p13 = scmp.lt.u32.totalorder %s783_s7, %s1023_s25 }
  0x80   : > { %p785_p7 = pnand %p784_p6, %p922_p4 }
  0x81   : > { %p790_p12 = por %p789_p11, %p788_p10 }
  0x82   : > { %p786_p9 = pneg %p785_p7 }
  0x83   : > { %p792_p0 = por %p791_p13, %p790_p12 }
  0x85   : > { %p793_p1 = pnand %p792_p0, %p786_p9 }
  0x87   : > { %796 = shalt.err (!%p793_p1)
}
  0x88   : > { %700 = dma.vmem_to_hbm [thread:$0]  (%p922_p4), %s1025_s16, 16, %s1023_s25, %s482_s27  }
  0x89 PF: > { %p706_p2 = scmp.ge.s32.totalorder %s847_s23, 2  ;;  %s534_s15 = sand.u32 1, %s827_s18  }
  0x8a   : > { %s535_s17 = scalar_lea.sflag [#allocation3], %s534_s15 }
  0x8b   : > { %p703_p3 = pnand %p706_p2, %p929_p8 }
  0x8d   : > { %822 = dma.done.wait (!%p703_p3), %s535_s17, 16  }
  0x8e   : > { %824 = vsyncadd (!%p703_p3), %s535_s17, 4294967280  ;;  %s19_s23 = sadd.s32 1, %s847_s23   ;;  %s1081_s18 = smov %s831_s19 }
  0x8f   : > { %p16_p5 = scmp.ge.s32.totalorder %s19_s23, 4   ;;  %s1082_s19 = smov %s835_s20 }
  0x90   : > { %s1083_s20 = smov %s935_s6  ;;  %s1084_s21 = smov %s843_s22 }
  0x91   : > { %s1085_s22 = smov %s1087_s26  ;;  %18 = sbr.rel (!%p16_p5) target bundleno = 4 (0x4), region = 106 }
  0x98   :  { %563 = vsyncpa [#allocation3], 1 }
  0x99   :  { %565 = vsyncpa [#allocation3 + $0x1], 1 }

</bundles_post_ra>
